<compile_context>
chip_gen: v6e
topology: v6e:2x2x1
jax: 0.10.0
libtpu: 0.0.40
codegen_flags: <defaults>
</compile_context>

<pallas_src>
import functools

import jax
import jax.numpy as jnp
from jax.experimental import pallas as pl
from jax.experimental.pallas import tpu as pltpu

IGNORE_INDEX = -100  # torch.nn.CrossEntropyLoss default
_LANE = 128


def _masked_ce_kernel(logits_ref, labels_ref, psum_ref, pcnt_ref, *, group_w):
    """One (row_tile, C) logits tile of masked cross-entropy.

    labels_ref holds the same rows' labels lane-major as (1, G, W) with
    W == group_w and G * W == row_tile.  Rows whose label == IGNORE_INDEX
    (including wrapper padding past the real end of the data and garbage rows
    of partial / clamped logits tiles) contribute neither to the loss sum nor
    to the token count.
    """
    ti = pl.program_id(1)

    @pl.when(ti == 0)
    def _():
        psum_ref[...] = jnp.zeros_like(psum_ref)
        pcnt_ref[...] = jnp.zeros_like(pcnt_ref)

    logits = logits_ref[...].astype(jnp.float32)          # (TM, C), cast in-kernel
    tm, c = logits.shape
    lab_lane = labels_ref[0]                              # (G, W) int32, lane-major
    g = lab_lane.shape[0]

    # ---- lane-major labels -> per-row (TM, 1) label column (iota-select) ----
    lab_exp = jnp.broadcast_to(lab_lane[:, None, :], (g, group_w, group_w))
    lab_exp = lab_exp.reshape(tm, group_w)                # row r -> its group's labels
    row_iota = jax.lax.broadcasted_iota(jnp.int32, (tm, group_w), 0)
    lane_iota = jax.lax.broadcasted_iota(jnp.int32, (tm, group_w), 1)
    if g == 1:
        row_in_group = row_iota                           # single group: r < W
    else:
        # group_w == 128 (power of two) whenever g > 1, by construction.
        row_in_group = jnp.bitwise_and(row_iota, group_w - 1)
    label_col = jnp.sum(jnp.where(lane_iota == row_in_group, lab_exp, 0),
                        axis=-1, keepdims=True)           # (TM, 1) int32
    valid_col = label_col != IGNORE_INDEX                 # (TM, 1) bool

    # ---- masked cross entropy (stable log-softmax; `shifted` reused) --------
    row_max = jnp.max(logits, axis=-1, keepdims=True)     # (TM, 1)
    shifted = logits - row_max                            # (TM, C)
    sum_exp = jnp.sum(jnp.exp(shifted), axis=-1, keepdims=True)      # (TM, 1)
    class_iota = jax.lax.broadcasted_iota(jnp.int32, (1, c), 1)      # (1, C)
    shifted_at_label = jnp.sum(
        jnp.where(class_iota == label_col, shifted, 0.0),
        axis=-1, keepdims=True)                                      # (TM, 1)
    per_row = jnp.where(valid_col, jnp.log(sum_exp) - shifted_at_label, 0.0)

    # ---- per-tile scalar partials accumulated into per-core output blocks ---
    psum_ref[...] += jnp.sum(per_row, axis=(0, 1),
                             keepdims=True).reshape(1, 1, 1)
    # Token count in the cheap lane-dense domain (f32 exact up to 2^24 tokens).
    pcnt_ref[...] += jnp.sum((lab_lane != IGNORE_INDEX).astype(jnp.float32),
                             axis=(0, 1), keepdims=True).reshape(1, 1, 1)


def _detect_chip():
    """Returns (is_v7x, default_num_cores); conservative fallback (False, 1)."""
    try:
        dev = jax.devices()[0]
        if dev.platform != "tpu":
            return False, 1
        kind = (getattr(dev, "device_kind", "") or "").lower()
        is_v7 = ("v7" in kind) or ("7x" in kind)
        return is_v7, (2 if is_v7 else 1)
    except Exception:  # pragma: no cover - defensive
        return False, 1


def _pick_row_tile(n, num_classes, itemsize, is_v7):
    """Rows per grid step: ~1-2 MiB of useful logits, capped by a VMEM budget."""
    lane_c = -(-num_classes // _LANE) * _LANE             # lane-padded class width
    target_bytes = 2 << 20                                # useful logits per step
    cap = 4096 if is_v7 else 8192                         # v7x: 64 MiB VMEM
    vmem_budget = (28 if is_v7 else 64) << 20
    per_row = (2 * lane_c * itemsize      # double-buffered native logits block
               + 4 * lane_c * 4           # f32 full-tile temporaries
               + 4 * _LANE * 4            # label-relayout int32 temporaries
               + 8 * _LANE * 4)           # (TM, 1) column temporaries
    rt = target_bytes // max(1, num_classes * itemsize)
    rt = min(rt, cap, max(_LANE, vmem_budget // per_row))
    rt = max(512, rt)
    return (rt // _LANE) * _LANE


@functools.partial(jax.jit,
                   static_argnames=("num_classes", "row_tile", "num_cores"))
def vqa_ser_token_layoutlm_loss(predicts, labels, attention_mask, *,
                                num_classes, row_tile=None, num_cores=None):
    """JAX/Pallas equivalent of VQASerTokenLayoutLMLoss.forward."""
    C = num_classes
    logits = predicts.reshape(-1, C)                      # (N, C), native dtype
    n = logits.shape[0]
    itemsize = jnp.dtype(logits.dtype).itemsize

    lab = labels.reshape(-1).astype(jnp.int32)            # (N,)
    if attention_mask is not None:
        # Fold the attention mask into the labels: masked tokens become IGNORE.
        lab = jnp.where(attention_mask.reshape(-1) == 1, lab, IGNORE_INDEX)

    is_v7, detected_cores = _detect_chip()
    if num_cores is None:
        num_cores = detected_cores

    # ---- tile sizing --------------------------------------------------------
    if n < _LANE:
        # Tiny problem: one block; group width == block height (multiple of 16
        # so both f32 and bf16 sublane tiling are satisfied).
        row_tile_eff = -(-n // 16) * 16
        group_w = row_tile_eff
        if row_tile_eff != n:            # negligible pad of a tiny array
            logits = jnp.pad(logits, ((0, row_tile_eff - n), (0, 0)))
    else:
        if row_tile is None:
            row_tile = _pick_row_tile(n, C, itemsize, is_v7)
        row_tile_eff = max(_LANE, (min(row_tile, n) // _LANE) * _LANE)
        group_w = _LANE

    n_logit_tiles = -(-max(n, 1) // row_tile_eff)          # cdiv
    # Megacore split (v7x): only when every core gets >= 3 tiles to pipeline.
    num_p = num_cores if (num_cores > 1 and n_logit_tiles >= 3 * num_cores) else 1
    t_per_core = -(-n_logit_tiles // num_p)
    n_tiles_total = num_p * t_per_core

    # ---- lane-dense labels: (n_tiles_total, row_tile/W, W), pad = IGNORE ----
    n_padded = n_tiles_total * row_tile_eff
    lab = jnp.pad(lab, (0, n_padded - n), constant_values=IGNORE_INDEX)
    labels3d = lab.reshape(n_tiles_total, row_tile_eff // group_w, group_w)

    def logits_map(pi, ti):
        # Cores whose remaining tiles run past the real data re-read the last
        # real logits tile; its labels tile is all IGNORE so it contributes 0.
        return (jnp.minimum(pi * t_per_core + ti, n_logit_tiles - 1), 0)

    def labels_map(pi, ti):
        return (pi * t_per_core + ti, 0, 0)

    out_map = lambda pi, ti: (pi, 0, 0)

    kernel = functools.partial(_masked_ce_kernel, group_w=group_w)

    cost = pl.CostEstimate(
        flops=6 * n * C,
        transcendentals=n * C + n,
        bytes_accessed=n * C * itemsize + n_padded * 4 + num_p * 8,
    )

    psum, pcnt = pl.pallas_call(
        kernel,
        out_shape=(
            jax.ShapeDtypeStruct((num_p, 1, 1), jnp.float32),
            jax.ShapeDtypeStruct((num_p, 1, 1), jnp.float32),
        ),
        grid_spec=pltpu.PrefetchScalarGridSpec(
            num_scalar_prefetch=0,
            grid=(num_p, t_per_core),
            in_specs=[
                pl.BlockSpec((row_tile_eff, C), logits_map),
                pl.BlockSpec((1, row_tile_eff // group_w, group_w), labels_map),
            ],
            out_specs=[
                pl.BlockSpec((1, 1, 1), out_map),
                pl.BlockSpec((1, 1, 1), out_map),
            ],
        ),
        compiler_params=pltpu.CompilerParams(
            dimension_semantics=("parallel", "arbitrary"),
            vmem_limit_bytes=(44 if is_v7 else 96) * 1024 * 1024,
        ),
        cost_estimate=cost,
    )(logits, labels3d)

    # Cross-core reduction + mean (NaN when no valid tokens, like torch).
    return jnp.sum(psum) / jnp.sum(pcnt)


def _reference_loss(predicts, labels, attention_mask, num_classes):
    """Pure-JAX reference mirroring torch CrossEntropyLoss semantics."""
    logits = predicts.reshape(-1, num_classes).astype(jnp.float32)
    lab = labels.reshape(-1).astype(jnp.int32)
    if attention_mask is not None:
        msk = attention_mask.reshape(-1).astype(jnp.int32)
        valid = (msk == 1) & (lab != IGNORE_INDEX)
    else:
        valid = lab != IGNORE_INDEX
    lse = jax.nn.logsumexp(logits, axis=-1)
    picked = jnp.take_along_axis(
        logits, jnp.clip(lab, 0, num_classes - 1)[:, None], axis=-1)[:, 0]
    per = jnp.where(valid, lse - picked, 0.0)
    return jnp.sum(per) / jnp.sum(valid.astype(jnp.float32))


if __name__ == "__main__":
    key = jax.random.PRNGKey(0)
    ks = jax.random.split(key, 6)

    # --- Test 1: tiny shape (single small block, group_w == block height) ----
    B, S, C = 2, 8, 32
    predicts = jax.random.normal(ks[0], (B, S, C), dtype=jnp.float32)
    labels = jax.random.randint(ks[1], (B, S), 0, C, dtype=jnp.int32)
    labels = labels.at[0, 3].set(IGNORE_INDEX)            # exercise ignore_index
    attention_mask = (jax.random.uniform(ks[2], (B, S)) > 0.3).astype(jnp.int32)
    attention_mask = attention_mask.at[0, 0].set(1)       # >=1 valid token

    loss = vqa_ser_token_layoutlm_loss(predicts, labels, attention_mask,
                                       num_classes=C)
    loss = jax.block_until_ready(loss)
    ref = _reference_loss(predicts, labels, attention_mask, C)
    assert jnp.allclose(loss, ref, rtol=1e-4, atol=1e-6), (loss, ref)

    # --- Test 2: bf16 logits streamed natively, auto tile, partial tail ------
    B2, S2 = 3, 500                                       # N = 1500 rows
    predicts2 = jax.random.normal(ks[3], (B2, S2, C), dtype=jnp.float32)
    predicts2_bf16 = predicts2.astype(jnp.bfloat16)
    labels2 = jax.random.randint(ks[4], (B2, S2), 0, C, dtype=jnp.int32)
    labels2 = labels2.at[1, 17].set(IGNORE_INDEX)
    mask2 = (jax.random.uniform(ks[5], (B2, S2)) > 0.2).astype(jnp.int32)
    mask2 = mask2.at[0, 0].set(1)

    loss2 = vqa_ser_token_layoutlm_loss(predicts2_bf16, labels2, mask2,
                                        num_classes=C)
    loss2 = jax.block_until_ready(loss2)
    ref2 = _reference_loss(predicts2_bf16, labels2, mask2, C)
    assert jnp.allclose(loss2, ref2, rtol=2e-3, atol=1e-4), (loss2, ref2)

    # --- Test 3: f32, explicit row_tile -> 3 tiles incl. partial tail --------
    loss3 = vqa_ser_token_layoutlm_loss(predicts2, labels2, mask2,
                                        num_classes=C, row_tile=512)
    loss3 = jax.block_until_ready(loss3)
    ref3 = _reference_loss(predicts2, labels2, mask2, C)
    assert jnp.allclose(loss3, ref3, rtol=1e-4, atol=1e-6), (loss3, ref3)

    print("KERNEL_OK")
</pallas_src>

<mosaic_0001>
module attributes {stable_mosaic.version = 11 : i64} {
  func.func @_masked_ce_kernel(%arg0: i32, %arg1: i32, %arg2: memref<16x32xf32, #tpu.memory_space<vmem>>, %arg3: memref<1x1x16xi32, #tpu.memory_space<vmem>>, %arg4: memref<1x1x1xf32, #tpu.memory_space<vmem>>, %arg5: memref<1x1x1xf32, #tpu.memory_space<vmem>>) attributes {dimension_semantics = [#tpu.dimension_semantics<parallel>, #tpu.dimension_semantics<arbitrary>], iteration_bounds = array<i64: 1, 1>, scalar_prefetch = 0 : i64, scratch_operands = 0 : i64, tpu.core_type = #tpu.core_type<tc>, window_params = [{transform_indices = @transform_0, window_bounds = array<i64: 16, 32>}, {transform_indices = @transform_1, window_bounds = array<i64: 1, 1, 16>}, {transform_indices = @transform_2, window_bounds = array<i64: 1, 1, 1>}, {transform_indices = @transform_3, window_bounds = array<i64: 1, 1, 1>}]} {
    %c0_i32 = arith.constant 0 : i32
    %0 = arith.cmpi eq, %arg1, %c0_i32 : i32
    %1 = arith.extui %0 : i1 to i32
    %c0_i32_0 = arith.constant 0 : i32
    %2 = arith.cmpi ne, %1, %c0_i32_0 : i32
    scf.if %2 {
      %cst_26 = arith.constant 0.000000e+00 : f32
      %60 = vector.broadcast %cst_26 : f32 to vector<1x1x1xf32>
      %c0_27 = arith.constant 0 : index
      %c0_28 = arith.constant 0 : index
      %c0_29 = arith.constant 0 : index
      %61 = vector.load %arg4[%c0_27, %c0_28, %c0_29] : memref<1x1x1xf32, #tpu.memory_space<vmem>>, vector<1x1x1xf32>
      tpu.vector_store %arg4[%c0_27, %c0_28, %c0_29], %60 {strides = array<i32>} : memref<1x1x1xf32, #tpu.memory_space<vmem>>, vector<1x1x1xf32>,
      %cst_30 = arith.constant 0.000000e+00 : f32
      %62 = vector.broadcast %cst_30 : f32 to vector<1x1x1xf32>
      %c0_31 = arith.constant 0 : index
      %c0_32 = arith.constant 0 : index
      %c0_33 = arith.constant 0 : index
      %63 = vector.load %arg5[%c0_31, %c0_32, %c0_33] : memref<1x1x1xf32, #tpu.memory_space<vmem>>, vector<1x1x1xf32>
      tpu.vector_store %arg5[%c0_31, %c0_32, %c0_33], %62 {strides = array<i32>} : memref<1x1x1xf32, #tpu.memory_space<vmem>>, vector<1x1x1xf32>,
    } else {
    }
    %c0 = arith.constant 0 : index
    %c0_1 = arith.constant 0 : index
    %3 = vector.load %arg2[%c0, %c0_1] : memref<16x32xf32, #tpu.memory_space<vmem>>, vector<16x32xf32>
    %c0_2 = arith.constant 0 : index
    %c0_3 = arith.constant 0 : index
    %c0_4 = arith.constant 0 : index
    %4 = vector.load %arg3[%c0_2, %c0_3, %c0_4] : memref<1x1x16xi32, #tpu.memory_space<vmem>>, vector<1x1x16xi32>
    %5 = vector.shape_cast %4 : vector<1x1x16xi32> to vector<1x16xi32>
    %6 = vector.shape_cast %5 : vector<1x16xi32> to vector<1x1x16xi32>
    %7 = vector.shape_cast %6 : vector<1x1x16xi32> to vector<1x1x16xi32>
    %8 = vector.broadcast %7 : vector<1x1x16xi32> to vector<1x16x16xi32>
    %9 = vector.shape_cast %8 : vector<1x16x16xi32> to vector<16x16xi32>
    %10 = tpu.iota {dimensions = array<i32: 0>} : vector<16x16xi32>
    %11 = tpu.iota {dimensions = array<i32: 1>} : vector<16x16xi32>
    %12 = arith.cmpi eq, %11, %10 : vector<16x16xi32>
    %c0_i32_5 = arith.constant 0 : i32
    %13 = vector.broadcast %c0_i32_5 : i32 to vector<16x16xi32>
    %14 = arith.select %12, %9, %13 : vector<16x16xi1>, vector<16x16xi32>
    %cst = arith.constant dense<0> : vector<16xi32>
    %15 = vector.multi_reduction <add>, %14, %cst [1] : vector<16x16xi32> to vector<16xi32>
    %16 = vector.shape_cast %15 : vector<16xi32> to vector<16x1xi32>
    %c-100_i32 = arith.constant -100 : i32
    %17 = vector.broadcast %c-100_i32 : i32 to vector<16x1xi32>
    %18 = arith.cmpi ne, %16, %17 : vector<16x1xi32>
    %cst_6 = arith.constant dense<0xFF800000> : vector<16xf32>
    %19 = vector.multi_reduction <maximumf>, %3, %cst_6 [1] : vector<16x32xf32> to vector<16xf32>
    %20 = vector.shape_cast %19 : vector<16xf32> to vector<16x1xf32>
    %21 = vector.broadcast %20 : vector<16x1xf32> to vector<16x32xf32>
    %22 = arith.subf %3, %21 : vector<16x32xf32>
    %23 = math.exp %22 : vector<16x32xf32>
    %cst_7 = arith.constant dense<0.000000e+00> : vector<16xf32>
    %24 = vector.multi_reduction <add>, %23, %cst_7 [1] : vector<16x32xf32> to vector<16xf32>
    %25 = vector.shape_cast %24 : vector<16xf32> to vector<16x1xf32>
    %26 = tpu.iota {dimensions = array<i32: 1>} : vector<1x32xi32>
    %27 = vector.broadcast %26 : vector<1x32xi32> to vector<16x32xi32>
    %28 = vector.broadcast %16 : vector<16x1xi32> to vector<16x32xi32>
    %29 = arith.cmpi eq, %27, %28 : vector<16x32xi32>
    %cst_8 = arith.constant 0.000000e+00 : f32
    %30 = vector.broadcast %cst_8 : f32 to vector<16x32xf32>
    %31 = arith.select %29, %22, %30 : vector<16x32xi1>, vector<16x32xf32>
    %cst_9 = arith.constant dense<0.000000e+00> : vector<16xf32>
    %32 = vector.multi_reduction <add>, %31, %cst_9 [1] : vector<16x32xf32> to vector<16xf32>
    %33 = vector.shape_cast %32 : vector<16xf32> to vector<16x1xf32>
    %34 = math.log %25 : vector<16x1xf32>
    %35 = arith.subf %34, %33 : vector<16x1xf32>
    %cst_10 = arith.constant 0.000000e+00 : f32
    %36 = vector.broadcast %cst_10 : f32 to vector<16x1xf32>
    %37 = arith.select %18, %35, %36 : vector<16x1xi1>, vector<16x1xf32>
    %c0_11 = arith.constant 0 : index
    %c0_12 = arith.constant 0 : index
    %c0_13 = arith.constant 0 : index
    %38 = vector.load %arg4[%c0_11, %c0_12, %c0_13] : memref<1x1x1xf32, #tpu.memory_space<vmem>>, vector<1x1x1xf32>
    %39 = vector.shape_cast %37 : vector<16x1xf32> to vector<1x16x1xf32>
    %cst_14 = arith.constant dense<0.000000e+00> : vector<1xf32>
    %40 = vector.multi_reduction <add>, %39, %cst_14 [1, 2] : vector<1x16x1xf32> to vector<1xf32>
    %41 = vector.shape_cast %40 : vector<1xf32> to vector<1x1x1xf32>
    %42 = vector.extract %41[0, 0, 0] : f32 from vector<1x1x1xf32>
    %43 = vector.broadcast %42 : f32 to vector<1x1xf32>
    %44 = vector.shape_cast %43 : vector<1x1xf32> to vector<1x1x1xf32>
    %45 = arith.addf %38, %44 : vector<1x1x1xf32>
    %c0_15 = arith.constant 0 : index
    %c0_16 = arith.constant 0 : index
    %c0_17 = arith.constant 0 : index
    %46 = vector.load %arg4[%c0_15, %c0_16, %c0_17] : memref<1x1x1xf32, #tpu.memory_space<vmem>>, vector<1x1x1xf32>
    tpu.vector_store %arg4[%c0_15, %c0_16, %c0_17], %45 {strides = array<i32>} : memref<1x1x1xf32, #tpu.memory_space<vmem>>, vector<1x1x1xf32>,
    %c0_18 = arith.constant 0 : index
    %c0_19 = arith.constant 0 : index
    %c0_20 = arith.constant 0 : index
    %47 = vector.load %arg5[%c0_18, %c0_19, %c0_20] : memref<1x1x1xf32, #tpu.memory_space<vmem>>, vector<1x1x1xf32>
    %c-100_i32_21 = arith.constant -100 : i32
    %48 = vector.broadcast %c-100_i32_21 : i32 to vector<1x16xi32>
    %49 = arith.cmpi ne, %5, %48 : vector<1x16xi32>
    %50 = arith.extui %49 : vector<1x16xi1> to vector<1x16xi32>
    %51 = arith.sitofp %50 : vector<1x16xi32> to vector<1x16xf32>
    %52 = vector.shape_cast %51 : vector<1x16xf32> to vector<1x1x16xf32>
    %cst_22 = arith.constant dense<0.000000e+00> : vector<1xf32>
    %53 = vector.multi_reduction <add>, %52, %cst_22 [1, 2] : vector<1x1x16xf32> to vector<1xf32>
    %54 = vector.shape_cast %53 : vector<1xf32> to vector<1x1x1xf32>
    %55 = vector.extract %54[0, 0, 0] : f32 from vector<1x1x1xf32>
    %56 = vector.broadcast %55 : f32 to vector<1x1xf32>
    %57 = vector.shape_cast %56 : vector<1x1xf32> to vector<1x1x1xf32>
    %58 = arith.addf %47, %57 : vector<1x1x1xf32>
    %c0_23 = arith.constant 0 : index
    %c0_24 = arith.constant 0 : index
    %c0_25 = arith.constant 0 : index
    %59 = vector.load %arg5[%c0_23, %c0_24, %c0_25] : memref<1x1x1xf32, #tpu.memory_space<vmem>>, vector<1x1x1xf32>
    tpu.vector_store %arg5[%c0_23, %c0_24, %c0_25], %58 {strides = array<i32>} : memref<1x1x1xf32, #tpu.memory_space<vmem>>, vector<1x1x1xf32>,
    return
  }
  func.func @transform_0(%arg0: i32, %arg1: i32) -> (i32, i32) {
    %c1_i32 = arith.constant 1 : i32
    %0 = arith.muli %arg0, %c1_i32 : i32
    %1 = arith.addi %0, %arg1 : i32
    %c0_i32 = arith.constant 0 : i32
    %2 = arith.minsi %1, %c0_i32 : i32
    %c0_i32_0 = arith.constant 0 : i32
    %c0_i32_1 = arith.constant 0 : i32
    return %2, %c0_i32_0 : i32, i32
  }
  func.func @transform_1(%arg0: i32, %arg1: i32) -> (i32, i32, i32) {
    %c1_i32 = arith.constant 1 : i32
    %0 = arith.muli %arg0, %c1_i32 : i32
    %1 = arith.addi %0, %arg1 : i32
    %c0_i32 = arith.constant 0 : i32
    %c0_i32_0 = arith.constant 0 : i32
    %c0_i32_1 = arith.constant 0 : i32
    return %1, %c0_i32, %c0_i32_0 : i32, i32, i32
  }
  func.func @transform_2(%arg0: i32, %arg1: i32) -> (i32, i32, i32) {
    %c0_i32 = arith.constant 0 : i32
    %c0_i32_0 = arith.constant 0 : i32
    %c0_i32_1 = arith.constant 0 : i32
    return %arg0, %c0_i32, %c0_i32_0 : i32, i32, i32
  }
  func.func @transform_3(%arg0: i32, %arg1: i32) -> (i32, i32, i32) {
    %c0_i32 = arith.constant 0 : i32
    %c0_i32_0 = arith.constant 0 : i32
    %c0_i32_1 = arith.constant 0 : i32
    return %arg0, %c0_i32, %c0_i32_0 : i32, i32, i32
  }
}

</mosaic_0001>

<bundles_post_ra>
// kernel: vqa_ser_token_layoutlm_loss.1
= control target key start
LH: loop header
LB: loop body
LE: loop exit
PB: predicated region body
PF: predicated region fallthrough
CT: control target
= control target key end

     0   :  { %9 = vsyncpa [#allocation3], 0  ;;  %s351_s0 = inlined_call_operand.hbm [shape: f32[16,32], index: 0, kind: input, shape index: {}]   ;;  %s352_s1 = inlined_call_operand.vmem [shape: s32[1,1,16], index: 1, kind: input, shape index: {}]   ;;  %s353_s2 = inlined_call_operand.hbm [shape: f32[1,1,1], index: 2, kind: output, shape index: {0}]   ;;  %s354_s3 = inlined_call_operand.hbm [shape: f32[1,1,1], index: 3, kind: output, shape index: {1}]  }
   0x1   :  { %10 = vsyncpa [#allocation4], 0 }
   0x2   :  { %11 = vsyncpa [#allocation7], 0  ;;  %s297_s12 = smov [#allocation2]  }
   0x3   :  { %s23_s13 = sshll.u32 %s297_s12, 4  ;;  %s24_s13 = int_to_ptr.vmem [resolvable:$true] %s23_s13 }
   0x4   :  { %s239_s14 = scalar_lea.vmem %s24_s13, 256  ;;  %p244_p1 = scmp.lt.s32.totalorder %s24_s13, %s24_s13 }
   0x5   :  { %p240_p0 = scmp.ne.s32.totalorder %s24_s13, %s239_s14  ;;  %p245_p2 = scmp.lt.s32.totalorder %s239_s14, %s239_s14 }
   0x7   :  { %p246_p3 = por %p245_p2, %p244_p1 }
   0x9   :  { %p247_p4 = pnand %p246_p3, %p240_p0 }
   0xb   :  { %250 = shalt.err (!%p247_p4)
}
   0xc   :  { %s298_s15 = smov 128   ;;  %s299_s16 = smov 8  }
   0xd   :  { %29 = dma.hbm_to_vmem [thread:$0]  %s351_s0, 256, %s24_s13, [#allocation3], %s298_s15, %s298_s15, %s299_s16  }
   0xe   :  { %291 = dma.done.wait [#allocation3], 256  }
   0xf   :  { %292 = vsyncadd [#allocation3], 4294967040  ;;  %v63_v0 = vlaneseq  ;;  %vm105_vm0 = vcmask 261120   ;;  %v60_v5 = vld [vmem:[#allocation2] sm:$0xff]  ;;  %v61_v6 = vld [vmem:[#allocation2 + $0x8] sm:$0xff]  ;;  %vm76_vm3 = vcmask 130048  }
  0x10   :  { %v62_v7 = vld [vmem:[%s352_s1] sm:$0x1]  ;;  %v106_v8 = vsel %vm105_vm0, %v60_v5, -inf  ;;  %v109_v10 = vsel %vm105_vm0, %v61_v6, -inf  ;;  %v300_v49 = vmov 0.0   ;;  %vm164_vm7 = vcmask 122880  }
  0x11   :  { %v64_v1 = vshrl.u32 %v63_v0, 7  ;;  %v326_v2 = vand.u32 127, %v63_v0  ;;  %107 = vmax.xlane.f32.xlu0 %v106_v8  ;;  %vm161_vm6 = vcmp.ne.s32.totalorder %v62_v7, 4294967196  ;;  %vm57_vm8 = vcmask 0   ;;  %s301_s0 = smov [#allocation5]   ;;  %s302_s22 = smov [#allocation6]  }
  0x12   :  { %v212_v50 = vsel %vm161_vm6, 1.0, %v300_v49  ;;  %58 = vst.msk [vmem:[#allocation5] sm:$0x1] %vm57_vm8, %v300_v49  ;;  %59 = vst.msk [vmem:[#allocation6] sm:$0x1] %vm57_vm8, %v300_v49  ;;  %vm143_vm10 = vcmask 7168  }
  0x13   :  { %v65_v3 = vsub.s32 0, %v64_v1  ;;  %v69_v4 = vadd.s32 8, %v64_v1  ;;  %vm72_vm1 = vcmp.eq.s32.totalorder %v326_v2, %v64_v1  ;;  %v165_v51 = vsel %vm164_vm7, %v212_v50, 0.0  ;;  %s184_s1 = sshll.u32 %s301_s0, 4  ;;  %s194_s23 = sshll.u32 %s302_s22, 4  ;;  %s185_s1 = int_to_ptr.vmem [resolvable:$true] %s184_s1  ;;  %s195_s23 = int_to_ptr.vmem [resolvable:$true] %s194_s23 }
  0x14   :  { %s251_s25 = scalar_lea.vmem %s185_s1, 16  ;;  %s255_s26 = scalar_lea.vmem %s185_s1, 32 }
  0x15   :  { %vm73_vm2 = vcmp.eq.s32.totalorder %v326_v2, %v69_v4  ;;  %v66_v9 = vrot.slane %v62_v7, %v65_v3  ;;  %110 = vmax.xlane.f32.xlu0 %v109_v10  ;;  %p252_p5 = scmp.ne.s32.totalorder %s185_s1, %s251_s25  ;;  %p256_p6 = scmp.lt.s32.totalorder %s185_s1, %s185_s1 }
  0x16   :  { %p257_p7 = scmp.lt.s32.totalorder %s255_s26, %s251_s25 }
  0x17   :  { %v74_v11 = vsel %vm72_vm1, %v66_v9, 0  ;;  %v75_v12 = vsel %vm73_vm2, %v66_v9, 0 }
  0x18   :  { %v77_v13 = vsel %vm76_vm3, %v74_v11, 0  ;;  %v90_v14 = vsel %vm76_vm3, %v75_v12, 0  ;;  %p258_p8 = por %p257_p7, %p256_p6 }
  0x19   :  { %v79_v15 = vshrl.u32 %v77_v13, 16  ;;  %v78_v16 = vand.u32 65535, %v77_v13  ;;  %v92_v17 = vshrl.u32 %v90_v14, 16  ;;  %v91_v21 = vand.u32 65535, %v90_v14 }
  0x1a   :  { %p259_p9 = pnand %p258_p8, %p252_p5 }
  0x1b   :  { %v81_v18 = vcvt.s32.f32 %v79_v15  ;;  %v80_v19 = vcvt.s32.f32 %v78_v16  ;;  %v94_v20 = vcvt.s32.f32 %v92_v17  ;;  %v93_v22 = vcvt.s32.f32 %v91_v21  ;;  %v142_v17 = vld [vmem:[#allocation5] sm:$0x1] }
  0x1d   :  { %84 = vadd.xlane.f32.xlu1 %v81_v18  ;;  %82 = vadd.xlane.f32.xlu0 %v80_v19  ;;  %v160_v18 = vld [vmem:[#allocation6] sm:$0x1] }
  0x21   :  { %97 = vadd.xlane.f32.xlu1 %v94_v20 }
  0x25   :  { %95 = vadd.xlane.f32.xlu1 %v93_v22 }
  0x9a   :  { %v108_v23 = vpop.xlane.xlu0 %107 }
  0x9b   :  { %v112_v24 = vsub.f32 %v60_v5, %v108_v23 }
  0x9d   :  { %v114_v25 = vmul.f32 1.442695, %v112_v24 }
  0x9e   :  { %v111_v26 = vpop.xlane.xlu0 %110 }
  0x9f   :  { %223 = vpow2.f32 %v114_v25  ;;  %v113_v27 = vsub.f32 %v61_v6, %v111_v26 }
  0xa1   :  { %v116_v28 = vmul.f32 1.442695, %v113_v27 }
  0xa3   :  { %225 = vpow2.f32 %v116_v28 }
  0xa6   :  { %v85_v29 = vpop.xlane.xlu1 %84  ;;  %v83_v31 = vpop.xlane.xlu0 %82 }
  0xa7   :  { %v87_v30 = vcvt.f32.s32 %v85_v29  ;;  %v86_v32 = vcvt.f32.s32 %v83_v31 }
  0xa9   :  { %v88_v33 = vshll.u32 %v87_v30, 16 }
  0xaa   :  { %v98_v34 = vpop.xlane.xlu1 %97 }
  0xab   :  { %v100_v35 = vcvt.f32.s32 %v98_v34  ;;  %v89_v36 = vadd.s32 %v88_v33, %v86_v32 }
  0xac   :  { %v224_v40 = vpop.eup %223 }
  0xad   :  { %v101_v37 = vshll.u32 %v100_v35, 16  ;;  %vm124_vm4 = vcmp.eq.s32.totalorder %v326_v2, %v89_v36  ;;  %v118_v42 = vsel %vm105_vm0, %v224_v40, 0.0  ;;  %vm103_vm9 = vcmp.ne.s32.totalorder %v89_v36, 4294967196 }
  0xae   :  { %v96_v38 = vpop.xlane.xlu1 %95  ;;  %119 = vadd.xlane.f32.xlu0 %v118_v42  ;;  %v126_v43 = vsel %vm124_vm4, %v112_v24, 0.0 }
  0xaf   :  { %v99_v39 = vcvt.f32.s32 %v96_v38  ;;  %v128_v46 = vsel %vm105_vm0, %v126_v43, 0.0 }
  0xb0   :  { %v226_v44 = vpop.eup %225 }
  0xb1   :  { %v102_v41 = vadd.s32 %v101_v37, %v99_v39  ;;  %v121_v45 = vsel %vm105_vm0, %v226_v44, 0.0 }
  0xb2   :  { %122 = vadd.xlane.f32.xlu1 %v121_v45  ;;  %129 = vadd.xlane.f32.xlu0 %v128_v46 }
  0xb3   :  { %vm125_vm5 = vcmp.eq.s32.totalorder %v326_v2, %v102_v41  ;;  %vm104_vm11 = vcmp.ne.s32.totalorder %v102_v41, 4294967196 }
  0xb4   :  { %v127_v47 = vsel %vm125_vm5, %v113_v27, 0.0 }
  0xb5   :  { %v131_v48 = vsel %vm105_vm0, %v127_v47, 0.0 }
  0xb6   :  { %132 = vadd.xlane.f32.xlu1 %v131_v48 }
  0xba   :  { %166 = vadd.xlane.f32.xlu1 %v165_v51 }
 0x137   :  { %v120_v52 = vpop.xlane.xlu0 %119 }
 0x138   :  { %227 = vlog2.f32 %v120_v52 }
 0x13b   :  { %v123_v53 = vpop.xlane.xlu1 %122  ;;  %v130_v56 = vpop.xlane.xlu0 %129 }
 0x13c   :  { %229 = vlog2.f32 %v123_v53 }
 0x13f   :  { %v133_v60 = vpop.xlane.xlu1 %132 }
 0x143   :  { %v167_v3 = vpop.xlane.xlu1 %166 }
 0x144   :  { %v168_v4 = vrot.slane %v167_v3, 4 }
 0x145   :  { %v228_v54 = vpop.eup %227 }
 0x146   :  { %v135_v55 = vmul.f32 0.6931472, %v228_v54  ;;  %v169_v5 = vadd.f32 %v168_v4, %v167_v3 }
 0x148   :  { %v138_v57 = vsub.f32 %v135_v55, %v130_v56  ;;  %v170_v6 = vrot.slane %v169_v5, 2 }
 0x149   :  { %v230_v58 = vpop.eup %229 }
 0x14a   :  { %v137_v59 = vmul.f32 0.6931472, %v230_v58  ;;  %v140_v61 = vsel %vm103_vm9, %v138_v57, 0.0  ;;  %v171_v10 = vadd.f32 %v170_v6, %v169_v5 }
 0x14b   :  { %v144_v0 = vsel %vm143_vm10, %v140_v61, 0.0 }
 0x14c   :  { %v139_v62 = vsub.f32 %v137_v59, %v133_v60  ;;  %v172_v13 = vrot.slane %v171_v10, 1 }
 0x14e   :  { %v141_v63 = vsel %vm104_vm11, %v139_v62, 0.0  ;;  %v173_v16 = vadd.f32 %v172_v13, %v171_v10 }
 0x14f   :  { %v145_v1 = vsel %vm143_vm10, %v141_v63, 0.0 }
 0x150   :  { %v146_v2 = vadd.f32 %v145_v1, %v144_v0 }
 0x152   :  { %147 = vadd.xlane.f32.xlu0 %v146_v2 }
 0x1db   :  { %v148_v7 = vpop.xlane.xlu0 %147 }
 0x1dc   :  { %v149_v8 = vrot.slane %v148_v7, 4 }
 0x1de   :  { %v150_v9 = vadd.f32 %v149_v8, %v148_v7 }
 0x1e0   :  { %v151_v11 = vrot.slane %v150_v9, 2 }
 0x1e2   :  { %v152_v12 = vadd.f32 %v151_v11, %v150_v9 }
 0x1e4   :  { %v153_v14 = vrot.slane %v152_v12, 1 }
 0x1e6   :  { %v154_v15 = vadd.f32 %v153_v14, %v152_v12 }
 0x1e8   :  { %213 = vpush %v154_v15 }
 0x1e9   :  { %215 = vpush %v173_v16 }
 0x219   :  { %s214_s21 = spop %213 }
 0x21a   :  { %v156_v19 = vstv %s214_s21  ;;  %s216_s24 = spop %215 }
 0x21b   :  { %v157_v20 = vadd.f32 %v156_v19, %v142_v17  ;;  %v175_v21 = vstv %s216_s24 }
 0x21c   :  { %v176_v22 = vadd.f32 %v175_v21, %v160_v18 }
 0x21d   :  { %159 = vst.msk [vmem:[#allocation5] sm:$0x1] %vm57_vm8, %v157_v20 }
 0x21e   :  { %177 = vst.msk [vmem:[#allocation6] sm:$0x1] %vm57_vm8, %v176_v22 }
 0x21f   :  { %262 = shalt.err (!%p259_p9)
}
 0x220   :  { %187 = dma.vmem_to_hbm [thread:$0]  %s185_s1, 16, %s353_s2, [#allocation4]  }
 0x221   :  { %s271_s29 = scalar_lea.vmem %s195_s23, 16  ;;  %s275_s30 = scalar_lea.vmem %s195_s23, 32 }
 0x222   :  { %p272_p10 = scmp.ne.s32.totalorder %s195_s23, %s271_s29  ;;  %p276_p11 = scmp.lt.s32.totalorder %s195_s23, %s195_s23 }
 0x223   :  { %p277_p12 = scmp.lt.s32.totalorder %s275_s30, %s271_s29 }
 0x225   :  { %p278_p13 = por %p277_p12, %p276_p11 }
 0x227   :  { %p279_p0 = pnand %p278_p13, %p272_p10 }
 0x229   :  { %282 = shalt.err (!%p279_p0)
}
 0x22a   :  { %197 = dma.vmem_to_hbm [thread:$0]  %s195_s23, 16, %s354_s3, [#allocation7]  }
 0x22b   :  { %293 = dma.done.wait [#allocation4], 16  }
 0x22c   :  { %294 = vsyncadd [#allocation4], 4294967280 }
 0x22d   :  { %295 = dma.done.wait [#allocation7], 16  }
 0x22e   :  { %296 = vsyncadd [#allocation7], 4294967280 }
 0x22f   :  { %204 = vsyncpa [#allocation3], 1 }
 0x230   :  { %205 = vsyncpa [#allocation4], 1 }
 0x231   :  { %206 = vsyncpa [#allocation7], 1 }

</bundles_post_ra>
